<compile_context>
chip_gen: v5e
topology: v5e:2x2
jax: 0.10.0
libtpu: 0.0.40
codegen_flags: <defaults>
</compile_context>

<pallas_src>
import functools

import jax
import jax.numpy as jnp
from jax.experimental import pallas as pl
from jax.experimental.pallas import tpu as pltpu


def _round_up(n, m):
    return (n + m - 1) // m * m


def _cdiv(a, b):
    return -(-a // b)


# --------------------------------- kernel ----------------------------------

def _make_kernel(layout, d):
    """layout[i] = (row_off, fan_in, fan_out).

    Weights are stored TRANSPOSED, (fan_out, fan_in), in columns [0:fan_in] of
    the packed buffer, with the bias in column `fan_in` of the same block.
    """
    n_layers = len(layout)

    def kernel(x_ref, p_ref, out_ref):
        h = x_ref[...]                                            # (d, tile_b) bf16
        for idx, (r, fin, fout) in enumerate(layout):
            b = p_ref[r:r + fout, fin:fin + 1].astype(jnp.float32)      # (fout, 1)
            if idx == 0 and fin <= 8:
                # Tiny-K first layer: VPU broadcast-FMAs (outer products)
                # instead of a K=d MXU pass.  f32 math on bf16-rounded inputs.
                xf = h.astype(jnp.float32)                        # (fin, tile_b)
                w = p_ref[r:r + fout, 0:fin].astype(jnp.float32)  # (fout, fin)
                acc = b + w[:, 0:1] * xf[0:1, :]
                for k in range(1, fin):
                    acc = acc + w[:, k:k + 1] * xf[k:k + 1, :]
                h = acc                                           # (fout, tile_b) f32
            else:
                w = p_ref[r:r + fout, 0:fin]                      # (fout, fin) bf16
                h = jnp.dot(w, h, preferred_element_type=jnp.float32) + b
            if idx < n_layers - 1:
                # ReLU in f32 (v5e VPU has no bf16), then bf16 for the next MXU.
                h = jnp.maximum(h, 0.0).astype(jnp.bfloat16)
        # h: (2d, tile_b) f32 = [mu rows | var rows].  Numerically stable
        # softplus (+1e-6) applied to the var rows only via a sublane mask.
        # (jnp.log(1+.) instead of log1p for guaranteed Mosaic lowering; the
        # accuracy difference is ~1 ulp for large |h|.)
        sp = jnp.maximum(h, 0.0) + jnp.log(1.0 + jnp.exp(-jnp.abs(h))) + 1e-6
        row = jax.lax.broadcasted_iota(jnp.int32, h.shape, 0)
        out_ref[...] = jnp.where(row < d, h, sp)

    return kernel


# --------------------------- host-side param prep ---------------------------

def _block_diag(a, b):
    out = jnp.zeros((a.shape[0] + b.shape[0], a.shape[1] + b.shape[1]), a.dtype)
    out = out.at[:a.shape[0], :a.shape[1]].set(a)
    out = out.at[a.shape[0]:, a.shape[1]:].set(b)
    return out


def fuse_branches(mu_layers, var_layers):
    """Fuse the two branch MLPs (lists of (W_in_major, b)) into one chain."""
    # TODO(synk): the len(num_hidden)==0 configuration (mu = Linear(d, d,
    # bias=False)) and branches of unequal depth have different semantics and
    # are not handled by this fused kernel.
    assert len(mu_layers) == len(var_layers) and len(mu_layers) >= 2
    fused = []
    for i, ((wm, bm), (wv, bv)) in enumerate(zip(mu_layers, var_layers)):
        if i == 0:
            w = jnp.concatenate([wm, wv], axis=1)        # both branches read x
        else:
            w = _block_diag(wm, wv)
        b = jnp.concatenate([bm, bv], axis=0)
        fused.append((w, b))
    return fused


def pack_params(fused, dtype=jnp.bfloat16):
    """Pack fused (W, b) layers into one aligned, VMEM-resident buffer.

    Weights are stored transposed (fan_out, fan_in) so the kernel's matmul
    chain is feature-major (batch on the lane axis); the bias sits in column
    `fan_in` of the same block.  bf16 = MXU-native input dtype (the kernel
    accumulates in f32).
    """
    width = _round_up(max(w.shape[0] for w, _ in fused) + 1, 128)
    blocks, layout, r = [], [], 0
    for w, b in fused:
        fin, fout = w.shape
        rows = _round_up(fout, 16)     # 16-row granularity: bf16 sublane packing
        blk = jnp.zeros((rows, width), jnp.float32)
        blk = blk.at[:fout, :fin].set(w.T)
        blk = blk.at[:fout, fin].set(b.reshape(-1))
        layout.append((r, fin, fout))
        blocks.append(blk)
        r += rows
    return jnp.concatenate(blocks, axis=0).astype(dtype), tuple(layout)


# ------------------------------ batch tiling --------------------------------

def _choose_batch_tiling(B, tile_b_max=2048):
    """Batch lives on the lane axis, so tiles are multiples of 128 lanes.

    Picks large tiles that (a) keep batch padding low and (b) give at least 2
    grid steps whenever there is enough real batch to shard across v7x's two
    TensorCores (the grid axis is "parallel").
    """
    LANE = 128
    n_tiles = max(1, _cdiv(B, LANE))            # 128-lane tiles of real batch
    nb = _cdiv(n_tiles * LANE, tile_b_max)      # steps needed at tile_b_max
    if n_tiles >= 2:
        nb = max(nb, 2)                         # let both v7x TCs work
    nb = min(nb, n_tiles)
    tiles_per_step = _cdiv(n_tiles, nb)
    tb = tiles_per_step * LANE
    nb = _cdiv(n_tiles, tiles_per_step)
    return nb * tb, tb, nb


# --------------------------------- forward ---------------------------------

def state_transition_forward(x, packed, *, layout, d, tile_b=2048,
                             return_diag=False):
    """x: (B, d) f32 -> (mu (B, d), var (B, d, d) diagonal matrices).

    With return_diag=True the raw diagonal (B, d) is returned instead of the
    dense diag_embed (saves a d-times-larger, mostly-zero HBM write).
    """
    B, d_in = x.shape
    assert d_in == d
    Bp, tb, nb = _choose_batch_tiling(B, tile_b)

    # Feature-major, lane-dense input: x^T (d, Bp) in bf16 (MXU-native, halves
    # the input DMA); batch padding is zero-filled.
    xt = jnp.pad(x.T.astype(packed.dtype), ((0, 0), (0, Bp - B)))

    flops = 2 * Bp * sum(fin * fout for _, fin, fout in layout)
    bytes_accessed = (xt.size * xt.dtype.itemsize
                      + packed.size * packed.dtype.itemsize
                      + Bp * 2 * d * 4)

    out = pl.pallas_call(
        _make_kernel(layout, d),
        out_shape=jax.ShapeDtypeStruct((2 * d, Bp), jnp.float32),
        grid=(nb,),
        in_specs=[
            pl.BlockSpec((d, tb), lambda i: (0, i)),        # batch-tiled x^T
            # Resident fused params: constant index_map -> fetched once,
            # never re-DMA'd across grid steps.
            pl.BlockSpec(packed.shape, lambda i: (0, 0)),
        ],
        out_specs=pl.BlockSpec((2 * d, tb), lambda i: (0, i)),  # lane-dense out
        compiler_params=pltpu.CompilerParams(
            dimension_semantics=("parallel",),              # shard batch over TCs
        ),
        cost_estimate=pl.CostEstimate(
            flops=flops,
            transcendentals=2 * Bp * 2 * d,
            bytes_accessed=bytes_accessed),
    )(xt, packed)

    mu = out[:d, :B].T                                      # (B, d)
    var = out[d:, :B].T                                     # (B, d)
    if return_diag:
        return mu, var
    return mu, var[:, :, None] * jnp.eye(d, dtype=var.dtype)   # torch.diag_embed


# ------------------------------ initialization ------------------------------

def _xavier_uniform(key, fan_in, fan_out):
    limit = float(jnp.sqrt(6.0 / (fan_in + fan_out)))
    return jax.random.uniform(key, (fan_in, fan_out), jnp.float32, -limit, limit)


def _linear_bias(key, fan_in, fan_out):
    bound = 1.0 / float(fan_in) ** 0.5
    return jax.random.uniform(key, (fan_out,), jnp.float32, -bound, bound)


def init_branch(key, dims):
    """dims = [d, h1, ..., hk, d]; weights stored input-major (in, out)."""
    keys = jax.random.split(key, 2 * (len(dims) - 1))
    layers = []
    for i in range(len(dims) - 1):
        fin, fout = dims[i], dims[i + 1]
        layers.append((_xavier_uniform(keys[2 * i], fin, fout),
                       _linear_bias(keys[2 * i + 1], fin, fout)))
    return layers


def reference_forward(x, mu_layers, var_layers, d, op_dtype=jnp.float32):
    """Pure-JAX reference.  op_dtype=jnp.bfloat16 mimics the kernel's MXU
    rounding (bf16 operands, f32 accumulation) for a tight comparison."""
    def lin(h, w, b):
        return (jnp.dot(h.astype(op_dtype), w.astype(op_dtype),
                        preferred_element_type=jnp.float32)
                + b.astype(op_dtype).astype(jnp.float32))
    l, vl = x, x
    for w, b in mu_layers[:-1]:
        l = jnp.maximum(lin(l, w, b), 0.0)
    for w, b in var_layers[:-1]:
        vl = jnp.maximum(lin(vl, w, b), 0.0)
    mu = lin(l, *mu_layers[-1])
    var = jax.nn.softplus(lin(vl, *var_layers[-1])) + 1e-6
    return mu, var[:, :, None] * jnp.eye(d, dtype=var.dtype)


if __name__ == "__main__":
    B, d = 8, 4
    num_hidden_mu = [32, 32]
    num_hidden_var = [32, 32]

    key = jax.random.PRNGKey(0)
    k_x, k_mu, k_var = jax.random.split(key, 3)
    x = jax.random.normal(k_x, (B, d), dtype=jnp.float32)

    mu_layers = init_branch(k_mu, [d] + num_hidden_mu + [d])
    var_layers = init_branch(k_var, [d] + num_hidden_var + [d])
    packed, layout = pack_params(fuse_branches(mu_layers, var_layers))

    fwd = jax.jit(functools.partial(state_transition_forward, layout=layout, d=d))
    mu, var_mat = fwd(x, packed)
    jax.block_until_ready((mu, var_mat))
    assert mu.shape == (B, d) and var_mat.shape == (B, d, d)

    # Tight check vs a reference that applies the same bf16 operand rounding.
    mu_bf, var_bf = reference_forward(x, mu_layers, var_layers, d,
                                      op_dtype=jnp.bfloat16)
    assert jnp.allclose(mu, mu_bf, atol=1e-3, rtol=1e-3)
    assert jnp.allclose(var_mat, var_bf, atol=1e-3, rtol=1e-3)

    # Semantic check vs the full-f32 forward (tolerance relaxed because the
    # kernel feeds the MXU bf16 inputs per the perf review).
    mu_ref, var_ref = reference_forward(x, mu_layers, var_layers, d)
    assert jnp.allclose(mu, mu_ref, atol=3e-2, rtol=3e-2)
    assert jnp.allclose(var_mat, var_ref, atol=3e-2, rtol=3e-2)

    diag = jnp.diagonal(var_mat, axis1=1, axis2=2)
    assert bool(jnp.all(diag > 0.0))
    assert bool(jnp.all(var_mat - diag[:, :, None] * jnp.eye(d) == 0.0))

    print("KERNEL_OK")
</pallas_src>

<mosaic_0001>
module attributes {stable_mosaic.version = 11 : i64} {
  func.func @kernel(%arg0: i32, %arg1: memref<4x128xbf16, #tpu.memory_space<vmem>>, %arg2: memref<144x128xbf16, #tpu.memory_space<vmem>>, %arg3: memref<8x128xf32, #tpu.memory_space<vmem>>) attributes {dimension_semantics = [#tpu.dimension_semantics<parallel>], iteration_bounds = array<i64: 1>, scalar_prefetch = 0 : i64, scratch_operands = 0 : i64, tpu.core_type = #tpu.core_type<tc>, window_params = [{transform_indices = @transform_0, window_bounds = array<i64: 4, 128>}, {pipeline_mode = #tpu.pipeline_mode<synchronous>, transform_indices = @transform_1, window_bounds = array<i64: 144, 128>}, {transform_indices = @transform_2, window_bounds = array<i64: 8, 128>}]} {
    %c0 = arith.constant 0 : index
    %c0_0 = arith.constant 0 : index
    %0 = vector.load %arg1[%c0, %c0_0] : memref<4x128xbf16, #tpu.memory_space<vmem>>, vector<4x128xbf16>
    %c0_1 = arith.constant 0 : index
    %c4 = arith.constant 4 : index
    %1 = vector.load %arg2[%c0_1, %c4] : memref<144x128xbf16, #tpu.memory_space<vmem>>, vector<64x1xbf16>
    %2 = arith.extf %1 : vector<64x1xbf16> to vector<64x1xf32>
    %3 = arith.extf %0 : vector<4x128xbf16> to vector<4x128xf32>
    %c0_2 = arith.constant 0 : index
    %c0_3 = arith.constant 0 : index
    %4 = vector.load %arg2[%c0_2, %c0_3] : memref<144x128xbf16, #tpu.memory_space<vmem>>, vector<64x4xbf16>
    %5 = arith.extf %4 : vector<64x4xbf16> to vector<64x4xf32>
    %6 = vector.extract_strided_slice %5 {offsets = [0, 0], sizes = [64, 1], strides = [1, 1]} : vector<64x4xf32> to vector<64x1xf32>
    %7 = vector.extract_strided_slice %3 {offsets = [0, 0], sizes = [1, 128], strides = [1, 1]} : vector<4x128xf32> to vector<1x128xf32>
    %8 = vector.broadcast %6 : vector<64x1xf32> to vector<64x128xf32>
    %9 = vector.broadcast %7 : vector<1x128xf32> to vector<64x128xf32>
    %10 = arith.mulf %8, %9 : vector<64x128xf32>
    %11 = vector.broadcast %2 : vector<64x1xf32> to vector<64x128xf32>
    %12 = arith.addf %11, %10 : vector<64x128xf32>
    %13 = vector.extract_strided_slice %5 {offsets = [0, 1], sizes = [64, 1], strides = [1, 1]} : vector<64x4xf32> to vector<64x1xf32>
    %14 = vector.extract_strided_slice %3 {offsets = [1, 0], sizes = [1, 128], strides = [1, 1]} : vector<4x128xf32> to vector<1x128xf32>
    %15 = vector.broadcast %13 : vector<64x1xf32> to vector<64x128xf32>
    %16 = vector.broadcast %14 : vector<1x128xf32> to vector<64x128xf32>
    %17 = arith.mulf %15, %16 : vector<64x128xf32>
    %18 = arith.addf %12, %17 : vector<64x128xf32>
    %19 = vector.extract_strided_slice %5 {offsets = [0, 2], sizes = [64, 1], strides = [1, 1]} : vector<64x4xf32> to vector<64x1xf32>
    %20 = vector.extract_strided_slice %3 {offsets = [2, 0], sizes = [1, 128], strides = [1, 1]} : vector<4x128xf32> to vector<1x128xf32>
    %21 = vector.broadcast %19 : vector<64x1xf32> to vector<64x128xf32>
    %22 = vector.broadcast %20 : vector<1x128xf32> to vector<64x128xf32>
    %23 = arith.mulf %21, %22 : vector<64x128xf32>
    %24 = arith.addf %18, %23 : vector<64x128xf32>
    %25 = vector.extract_strided_slice %5 {offsets = [0, 3], sizes = [64, 1], strides = [1, 1]} : vector<64x4xf32> to vector<64x1xf32>
    %26 = vector.extract_strided_slice %3 {offsets = [3, 0], sizes = [1, 128], strides = [1, 1]} : vector<4x128xf32> to vector<1x128xf32>
    %27 = vector.broadcast %25 : vector<64x1xf32> to vector<64x128xf32>
    %28 = vector.broadcast %26 : vector<1x128xf32> to vector<64x128xf32>
    %29 = arith.mulf %27, %28 : vector<64x128xf32>
    %30 = arith.addf %24, %29 : vector<64x128xf32>
    %cst = arith.constant 0.000000e+00 : f32
    %31 = vector.broadcast %cst : f32 to vector<64x128xf32>
    %32 = arith.maximumf %30, %31 : vector<64x128xf32>
    %33 = arith.truncf %32 : vector<64x128xf32> to vector<64x128xbf16>
    %c64 = arith.constant 64 : index
    %c64_4 = arith.constant 64 : index
    %34 = vector.load %arg2[%c64, %c64_4] : memref<144x128xbf16, #tpu.memory_space<vmem>>, vector<64x1xbf16>
    %35 = arith.extf %34 : vector<64x1xbf16> to vector<64x1xf32>
    %c64_5 = arith.constant 64 : index
    %c0_6 = arith.constant 0 : index
    %36 = vector.load %arg2[%c64_5, %c0_6] : memref<144x128xbf16, #tpu.memory_space<vmem>>, vector<64x64xbf16>
    %cst_7 = arith.constant dense<0.000000e+00> : vector<64x128xf32>
    %37 = tpu.matmul %36, %33, %cst_7 {dimension_numbers = #tpu.dot_dimension_numbers<[1], [0], [0], [1], [0, 0, 1, 1], [], []>} : vector<64x64xbf16>, vector<64x128xbf16>, vector<64x128xf32> -> vector<64x128xf32>
    %38 = vector.broadcast %35 : vector<64x1xf32> to vector<64x128xf32>
    %39 = arith.addf %37, %38 : vector<64x128xf32>
    %cst_8 = arith.constant 0.000000e+00 : f32
    %40 = vector.broadcast %cst_8 : f32 to vector<64x128xf32>
    %41 = arith.maximumf %39, %40 : vector<64x128xf32>
    %42 = arith.truncf %41 : vector<64x128xf32> to vector<64x128xbf16>
    %c128 = arith.constant 128 : index
    %c64_9 = arith.constant 64 : index
    %43 = vector.load %arg2[%c128, %c64_9] : memref<144x128xbf16, #tpu.memory_space<vmem>>, vector<8x1xbf16>
    %44 = arith.extf %43 : vector<8x1xbf16> to vector<8x1xf32>
    %c128_10 = arith.constant 128 : index
    %c0_11 = arith.constant 0 : index
    %45 = vector.load %arg2[%c128_10, %c0_11] : memref<144x128xbf16, #tpu.memory_space<vmem>>, vector<8x64xbf16>
    %cst_12 = arith.constant dense<0.000000e+00> : vector<8x128xf32>
    %46 = tpu.matmul %45, %42, %cst_12 {dimension_numbers = #tpu.dot_dimension_numbers<[1], [0], [0], [1], [0, 0, 1, 1], [], []>} : vector<8x64xbf16>, vector<64x128xbf16>, vector<8x128xf32> -> vector<8x128xf32>
    %47 = vector.broadcast %44 : vector<8x1xf32> to vector<8x128xf32>
    %48 = arith.addf %46, %47 : vector<8x128xf32>
    %cst_13 = arith.constant 0.000000e+00 : f32
    %49 = vector.broadcast %cst_13 : f32 to vector<8x128xf32>
    %50 = arith.maximumf %48, %49 : vector<8x128xf32>
    %51 = math.absf %48 : vector<8x128xf32>
    %cst_14 = arith.constant 0.000000e+00 : f32
    %52 = vector.broadcast %cst_14 : f32 to vector<8x128xf32>
    %53 = arith.subf %52, %51 : vector<8x128xf32>
    %54 = math.exp %53 : vector<8x128xf32>
    %cst_15 = arith.constant 1.000000e+00 : f32
    %55 = vector.broadcast %cst_15 : f32 to vector<8x128xf32>
    %56 = arith.addf %55, %54 : vector<8x128xf32>
    %57 = math.log %56 : vector<8x128xf32>
    %58 = arith.addf %50, %57 : vector<8x128xf32>
    %cst_16 = arith.constant 9.99999997E-7 : f32
    %59 = vector.broadcast %cst_16 : f32 to vector<8x128xf32>
    %60 = arith.addf %58, %59 : vector<8x128xf32>
    %61 = tpu.iota {dimensions = array<i32: 0>} : vector<8x128xi32>
    %c4_i32 = arith.constant 4 : i32
    %62 = vector.broadcast %c4_i32 : i32 to vector<8x128xi32>
    %63 = arith.cmpi slt, %61, %62 : vector<8x128xi32>
    %64 = arith.select %63, %48, %60 : vector<8x128xi1>, vector<8x128xf32>
    %c0_17 = arith.constant 0 : index
    %c0_18 = arith.constant 0 : index
    %65 = vector.load %arg3[%c0_17, %c0_18] : memref<8x128xf32, #tpu.memory_space<vmem>>, vector<8x128xf32>
    tpu.vector_store %arg3[%c0_17, %c0_18], %64 {strides = array<i32>} : memref<8x128xf32, #tpu.memory_space<vmem>>, vector<8x128xf32>,
    return
  }
  func.func @transform_0(%arg0: i32) -> (i32, i32) {
    %c0_i32 = arith.constant 0 : i32
    %c0_i32_0 = arith.constant 0 : i32
    return %c0_i32, %arg0 : i32, i32
  }
  func.func @transform_1(%arg0: i32) -> (i32, i32) {
    %c0_i32 = arith.constant 0 : i32
    %c0_i32_0 = arith.constant 0 : i32
    %c0_i32_1 = arith.constant 0 : i32
    return %c0_i32, %c0_i32_0 : i32, i32
  }
  func.func @transform_2(%arg0: i32) -> (i32, i32) {
    %c0_i32 = arith.constant 0 : i32
    %c0_i32_0 = arith.constant 0 : i32
    return %c0_i32, %arg0 : i32, i32
  }
}

</mosaic_0001>

<bundles_post_ra>
// kernel: state_transition_forward.1
= control target key start
LH: loop header
LB: loop body
LE: loop exit
PB: predicated region body
PF: predicated region fallthrough
CT: control target
= control target key end

     0   :  { %7 = vsyncpa [#allocation3], 0  ;;  %s698_s12 = smov [#allocation2]   ;;  %s699_s14 = smov 64   ;;  %s784_s0 = inlined_call_operand.vmem [shape: bf16[4,128], index: 0, kind: input, shape index: {}]   ;;  %s785_s1 = inlined_call_operand.hbm [shape: bf16[144,128], index: 1, kind: input, shape index: {}]   ;;  %s786_s2 = inlined_call_operand.vmem [shape: f32[8,128], index: 2, kind: output, shape index: {}]  }
   0x1   :  { %s14_s11 = sshll.u32 %s785_s1, 4  ;;  %s16_s13 = sshll.u32 %s698_s12, 4  ;;  %s15_s11 = int_to_ptr.hbm [resolvable:$true] %s14_s11  ;;  %s17_s13 = int_to_ptr.vmem [resolvable:$true] %s16_s13 }
   0x2   :  { %s700_s15 = smov 4  }
   0x3   :  { %22 = dma.hbm_to_vmem [thread:$0]  %s15_s11, 1152, %s17_s13, [#allocation3], %s699_s14, %s699_s14, %s700_s15  }
   0x4   :  { %696 = dma.done.wait [#allocation3], 1152  }
   0x5   :  { %697 = vsyncadd [#allocation3], 4294966144  ;;  %v701_v0 = vmov 1   ;;  %v702_v1 = vmov 4   ;;  %v703_v2 = vmov 2   ;;  %v510_v3 = vld [vmem:[#allocation2 + $0x18] sm:$0xff]  }
   0x6   :  { %540 = vset.pattern.permute.xlu1 %v701_v0  ;;  %528 = vset.pattern.permute.xlu0 %v702_v1  ;;  %v506_v4 = vunpack.c.l.bf16 %v510_v3  ;;  %v507_v5 = vunpack.c.h.bf16 %v510_v3  ;;  %v509_v7 = vld [vmem:[#allocation2 + $0x10] sm:$0xff]   ;;  %v508_v11 = vld [vmem:[#allocation2 + $0x8] sm:$0xff]   ;;  %v704_v12 = vmov 0   ;;  %v493_v16 = vld [vmem:[#allocation2] sm:$0xff]   ;;  %v705_v19 = vmov 3  }
   0x7   :  { %552 = vset.pattern.permute.xlu2 %v703_v2  ;;  %v502_v8 = vunpack.c.l.bf16 %v509_v7  ;;  %v503_v9 = vunpack.c.h.bf16 %v509_v7  ;;  %v498_v13 = vunpack.c.l.bf16 %v508_v11  ;;  %v499_v14 = vunpack.c.h.bf16 %v508_v11  ;;  %v28_v25 = vld [vmem:[%s784_s0] sm:$0x3] }
   0x8   :  { %v541_v6 = vpack.i.bf16 %v507_v5, %v506_v4  ;;  %v494_v17 = vunpack.c.l.bf16 %v493_v16  ;;  %v495_v18 = vunpack.c.h.bf16 %v493_v16  ;;  %v45_v27 = vunpack.c.l.bf16 %v28_v25 }
   0x9   :  { %v547_v10 = vpack.i.bf16 %v503_v9, %v502_v8  ;;  %v576_v15 = vpack.i.bf16 %v499_v14, %v498_v13  ;;  %vm370_vm0 = vcmask 523264  }
   0xa   :  { %542 = vperm.xlu1 %540, %v541_v6   ;;  %530 = vperm.xlu0 %528, %v541_v6   ;;  %v605_v20 = vpack.i.bf16 %v495_v18, %v494_v17  ;;  %v728_v28 = vperm.slane %v45_v27, 0  ;;  %v730_v31 = vperm.slane %v45_v27, 1  ;;  %v732_v40 = vperm.slane %v45_v27, 2 }
   0xb   :  { %554 = vperm.xlu2 %552, %v541_v6   ;;  %v734_v41 = vperm.slane %v45_v27, 3 }
  0x12   :  { %546 = vset.pattern.permute.xlu1 %v704_v12  ;;  %534 = vset.pattern.permute.xlu0 %v704_v12 }
  0x13   :  { %536 = vperm.xlu0 %534, %v541_v6   ;;  %548 = vperm.xlu1 %546, %v547_v10  }
  0x14   :  { %558 = vset.pattern.permute.xlu2 %v702_v1 }
  0x15   :  { %560 = vperm.xlu2 %558, %v547_v10  }
  0x1b   :  { %564 = vset.pattern.permute.xlu1 %v701_v0  ;;  %577 = vperm.xlu0 %534, %v576_v15  }
  0x1c   :  { %566 = vperm.xlu1 %564, %v547_v10  }
  0x1d   :  { %570 = vset.pattern.permute.xlu2 %v705_v19 }
  0x1e   :  { %572 = vperm.xlu2 %570, %v541_v6  }
  0x23   :  { %606 = vperm.xlu0 %534, %v605_v20  }
  0x24   :  { %581 = vset.pattern.permute.xlu1 %v703_v2 }
  0x25   :  { %583 = vperm.xlu1 %581, %v547_v10  }
  0x26   :  { %587 = vset.pattern.permute.xlu2 %v702_v1 }
  0x27   :  { %589 = vperm.xlu2 %587, %v576_v15  }
  0x2b   :  { %622 = vset.pattern.permute.xlu0 %v701_v0 }
  0x2c   :  { %624 = vperm.xlu0 %622, %v605_v20  }
  0x2d   :  { %593 = vset.pattern.permute.xlu1 %v701_v0 }
  0x2e   :  { %595 = vperm.xlu1 %593, %v576_v15  }
  0x2f   :  { %599 = vset.pattern.permute.xlu2 %v705_v19 }
  0x30   :  { %601 = vperm.xlu2 %599, %v547_v10  }
  0x36   :  { %610 = vset.pattern.permute.xlu1 %v703_v2 }
  0x37   :  { %612 = vperm.xlu1 %610, %v576_v15  }
  0x38   :  { %616 = vset.pattern.permute.xlu2 %v702_v1 }
  0x39   :  { %618 = vperm.xlu2 %616, %v605_v20  }
  0x3f   :  { %628 = vset.pattern.permute.xlu1 %v705_v19 }
  0x40   :  { %630 = vperm.xlu1 %628, %v576_v15  }
  0x41   :  { %634 = vset.pattern.permute.xlu2 %v703_v2 }
  0x42   :  { %636 = vperm.xlu2 %634, %v605_v20  }
  0x48   :  { %641 = vperm.xlu1 %628, %v605_v20  }
  0x65   :  { %v555_v21 = vpop.permute.xlu2 %554 }
  0x66   :  { %v557_v38 = vunpack.i.h.bf16 %v555_v21  ;;  %v556_v39 = vunpack.i.l.bf16 %v555_v21 }
  0x68   :  { %v223_v51 = vmul.f32 %v556_v39, %v732_v40  ;;  %v224_v52 = vmul.f32 %v557_v38, %v732_v40 }
  0x6f   :  { %v561_v22 = vpop.permute.xlu2 %560 }
  0x70   :  { %v563_v4 = vunpack.i.h.bf16 %v561_v22  ;;  %v562_v5 = vunpack.i.l.bf16 %v561_v22 }
  0x78   :  { %v573_v26 = vpop.permute.xlu2 %572 }
  0x79   :  { %v575_v42 = vunpack.i.h.bf16 %v573_v26  ;;  %v574_v43 = vunpack.i.l.bf16 %v573_v26 }
  0x7b   :  { %v272_v53 = vmul.f32 %v574_v43, %v734_v41  ;;  %v273_v54 = vmul.f32 %v575_v42, %v734_v41  ;;  %v298_v43 = vld [vmem:[#allocation2 + $0x30] sm:$0xff]  }
  0x7c   :  { %v543_v23 = vpop.permute.xlu1 %542  ;;  %v531_v24 = vpop.permute.xlu0 %530 }
  0x7d   :  { %v545_v29 = vunpack.i.h.bf16 %v543_v23  ;;  %v544_v30 = vunpack.i.l.bf16 %v543_v23  ;;  %v533_v34 = vunpack.i.h.bf16 %v531_v24  ;;  %v532_v35 = vunpack.i.l.bf16 %v531_v24 }
  0x7f   :  { %v174_v46 = vmul.f32 %v544_v30, %v730_v31  ;;  %v175_v47 = vmul.f32 %v545_v29, %v730_v31 }
  0x81   :  { %v740_v50 = vpop.permute.xlu2 %589 }
  0x85   :  { %v537_v32 = vpop.permute.xlu0 %536  ;;  %v549_v33 = vpop.permute.xlu1 %548 }
  0x86   :  { %v539_v36 = vunpack.i.h.bf16 %v537_v32  ;;  %v538_v37 = vunpack.i.l.bf16 %v537_v32  ;;  %v551_v60 = vunpack.i.h.bf16 %v549_v33  ;;  %v550_v61 = vunpack.i.l.bf16 %v549_v33 }
  0x88   :  { %v93_v44 = vmul.f32 %v538_v37, %v728_v28  ;;  %v94_v45 = vmul.f32 %v539_v36, %v728_v28  ;;  %v91_v6 = vmul.f32 %v550_v61, %v728_v28  ;;  %v92_v7 = vmul.f32 %v551_v60, %v728_v28 }
  0x8a   :  { %v133_v48 = vadd.f32 %v532_v35, %v93_v44  ;;  %v134_v49 = vadd.f32 %v533_v34, %v94_v45  ;;  %v602_v8 = vpop.permute.xlu2 %601  ;;  %v131_v15 = vadd.f32 %v562_v5, %v91_v6  ;;  %v132_v16 = vadd.f32 %v563_v4, %v92_v7 }
  0x8b   :  { %v604_v10 = vunpack.i.h.bf16 %v602_v8  ;;  %v603_v11 = vunpack.i.l.bf16 %v602_v8 }
  0x8c   :  { %v182_v55 = vadd.f32 %v174_v46, %v133_v48  ;;  %v183_v56 = vadd.f32 %v175_v47, %v134_v49  ;;  %v706_v46 = vmov 64   ;;  %v306_v47 = vunpack.c.l.bf16 %v298_v43 }
  0x8d   :  { %v578_v19 = vpop.permute.xlu0 %577  ;;  %v270_v20 = vmul.f32 %v603_v11, %v734_v41  ;;  %v271_v21 = vmul.f32 %v604_v10, %v734_v41  ;;  %651 = vset.pattern.permute.xlu0 %v706_v46  ;;  %v307_v48 = vunpack.c.h.bf16 %v298_v43  ;;  %657 = vset.pattern.permute.xlu1 %v706_v46 }
  0x8e   :  { %v567_v57 = vpop.permute.xlu1 %566  ;;  %v231_v58 = vadd.f32 %v223_v51, %v182_v55  ;;  %v232_v59 = vadd.f32 %v224_v52, %v183_v56  ;;  %v580_v38 = vunpack.i.h.bf16 %v578_v19  ;;  %v579_v39 = vunpack.i.l.bf16 %v578_v19  ;;  %645 = vset.pattern.permute.xlu2 %v706_v46 }
  0x8f   :  { %v569_v0 = vunpack.i.h.bf16 %v567_v57  ;;  %v568_v1 = vunpack.i.l.bf16 %v567_v57  ;;  %v592_v52 = vunpack.i.h.bf16 %v740_v50 }
  0x90   :  { %v280_v62 = vadd.f32 %v272_v53, %v231_v58  ;;  %v281_v63 = vadd.f32 %v273_v54, %v232_v59  ;;  %v591_v53 = vunpack.i.l.bf16 %v740_v50  ;;  %v652_v54 = vpack.i.bf16 %v307_v48, %v306_v47  ;;  %v294_v48 = vld [vmem:[#allocation2 + $0x20] sm:$0xff]  }
  0x91   :  { %v172_v12 = vmul.f32 %v568_v1, %v730_v31  ;;  %v173_v13 = vmul.f32 %v569_v0, %v730_v31  ;;  %v89_v55 = vmul.f32 %v579_v39, %v728_v28  ;;  %v90_v56 = vmul.f32 %v580_v38, %v728_v28 }
  0x92   :  { %v288_v2 = vmax.f32 %v280_v62, 0.0  ;;  %v289_v3 = vmax.f32 %v281_v63, 0.0  ;;  %653 = vperm.xlu0 %651, %v652_v54  }
  0x93   :  { %v180_v22 = vadd.f32 %v172_v12, %v131_v15  ;;  %v181_v23 = vadd.f32 %v173_v13, %v132_v16  ;;  %v619_v37 = vpop.permute.xlu2 %618  ;;  %v130_v4 = vadd.f32 %v592_v52, %v90_v56  ;;  %v772_v52 = vld [vmem:[#allocation2 + $0x40] sm:$0xf]  ;;  %v303_v56 = vunpack.c.h.bf16 %v294_v48 }
  0x94   :  { %v293_v9 = vpack.c.bf16 %v289_v3, %v288_v2  ;;  %v621_v62 = vunpack.i.h.bf16 %v619_v37  ;;  %v620_v63 = vunpack.i.l.bf16 %v619_v37  ;;  %v129_v3 = vadd.f32 %v591_v53, %v89_v55 }
  0x95   :  { %v607_v36 = vpop.permute.xlu0 %606  ;;  %v302_v55 = vunpack.c.l.bf16 %v294_v48  ;;  %v457_v48 = vlaneseq }
  0x96   :  { %387 = vmatpush.bf16.msra.mxu0 %v293_v9  ;;  %511 = vmatpush.bf16.msra.mxu2 %v293_v9  ;;  %v609_v44 = vunpack.i.h.bf16 %v607_v36  ;;  %v608_v45 = vunpack.i.l.bf16 %v607_v36 }
  0x97   :  { %512 = vmatpush.bf16.msra.mxu3 %v293_v9  ;;  %v584_v14 = vpop.permute.xlu1 %583 }
  0x98   :  { %v586_v17 = vunpack.i.h.bf16 %v584_v14  ;;  %v585_v18 = vunpack.i.l.bf16 %v584_v14  ;;  %v87_v60 = vmul.f32 %v608_v45, %v728_v28  ;;  %v88_v61 = vmul.f32 %v609_v44, %v728_v28 }
  0x9a   :  { %v221_v24 = vmul.f32 %v585_v18, %v732_v40  ;;  %v222_v25 = vmul.f32 %v586_v17, %v732_v40  ;;  %v127_v8 = vadd.f32 %v620_v63, %v87_v60  ;;  %v128_v9 = vadd.f32 %v621_v62, %v88_v61  ;;  %v490_v60 = vld [vmem:[#allocation2 + $0x30] sm:$0xff]  ;;  %v491_v62 = vld [vmem:[#allocation2 + $0x38] sm:$0xff] }
  0x9b   :  { %v663_v61 = vpack.i.bf16 %v303_v56, %v302_v55 }
  0x9c   :  { %v229_v26 = vadd.f32 %v221_v24, %v180_v22  ;;  %v230_v27 = vadd.f32 %v222_v25, %v181_v23  ;;  %v637_v5 = vpop.permute.xlu2 %636 }
  0x9d   :  { %v639_v16 = vunpack.i.h.bf16 %v637_v5  ;;  %v638_v17 = vunpack.i.l.bf16 %v637_v5 }
  0x9e   :  { %v278_v29 = vadd.f32 %v270_v20, %v229_v26  ;;  %v279_v30 = vadd.f32 %v271_v21, %v230_v27  ;;  %v625_v57 = vpop.permute.xlu0 %624 }
  0x9f   :  { %v627_v50 = vunpack.i.h.bf16 %v625_v57  ;;  %v626_v2 = vunpack.i.l.bf16 %v625_v57  ;;  %v217_v25 = vmul.f32 %v638_v17, %v732_v40  ;;  %v218_v27 = vmul.f32 %v639_v16, %v732_v40 }
  0xa0   :  { %v596_v32 = vpop.permute.xlu1 %595  ;;  %v286_v33 = vmax.f32 %v278_v29, 0.0  ;;  %v287_v34 = vmax.f32 %v279_v30, 0.0  ;;  %v425_v57 = vunpack.c.l.bf16 %v772_v52 }
  0xa1   :  { %v598_v49 = vunpack.i.h.bf16 %v596_v32  ;;  %v597_v51 = vunpack.i.l.bf16 %v596_v32  ;;  %v168_v14 = vmul.f32 %v626_v2, %v730_v31  ;;  %v169_v15 = vmul.f32 %v627_v50, %v730_v31  ;;  %v296_v32 = vld [vmem:[#allocation2 + $0x28] sm:$0xff]  }
  0xa2   :  { %v292_v35 = vpack.c.bf16 %v287_v34, %v286_v33  ;;  %v304_v33 = vunpack.c.l.bf16 %v296_v32  ;;  %v305_v34 = vunpack.c.h.bf16 %v296_v32 }
  0xa3   :  { %v170_v0 = vmul.f32 %v597_v51, %v730_v31  ;;  %v171_v1 = vmul.f32 %v598_v49, %v730_v31  ;;  %v176_v24 = vadd.f32 %v168_v14, %v127_v8  ;;  %v177_v26 = vadd.f32 %v169_v15, %v128_v9 }
  0xa4   :  { %388 = vmatpush.bf16.msra.mxu0 %v292_v35  ;;  %513 = vmatpush.bf16.msra.mxu2 %v292_v35  ;;  %v658_v43 = vpack.i.bf16 %v305_v34, %v304_v33 }
  0xa5   :  { %514 = vmatpush.bf16.msra.mxu3 %v292_v35  ;;  %v178_v28 = vadd.f32 %v170_v0, %v129_v3  ;;  %v179_v11 = vadd.f32 %v171_v1, %v130_v4  ;;  %v300_v35 = vld [vmem:[#allocation2 + $0x38] sm:$0xff]   ;;  %v226_v45 = vadd.f32 %v218_v27, %v177_v26 }
  0xa6   :  { %v308_v39 = vunpack.c.l.bf16 %v300_v35  ;;  %v309_v44 = vunpack.c.h.bf16 %v300_v35  ;;  %659 = vperm.xlu1 %657, %v658_v43  }
  0xa9   :  { %v613_v42 = vpop.permute.xlu1 %612 }
  0xaa   :  { %v615_v58 = vunpack.i.h.bf16 %v613_v42  ;;  %v614_v59 = vunpack.i.l.bf16 %v613_v42  ;;  %v225_v42 = vadd.f32 %v217_v25, %v176_v24 }
  0xac   :  { %v219_v6 = vmul.f32 %v614_v59, %v732_v40  ;;  %v220_v7 = vmul.f32 %v615_v58, %v732_v40  ;;  %v646_v40 = vpack.i.bf16 %v309_v44, %v308_v39  ;;  %v489_v59 = vld [vmem:[#allocation2 + $0x28] sm:$0xff] }
  0xae   :  { %v227_v18 = vadd.f32 %v219_v6, %v178_v28  ;;  %v228_v19 = vadd.f32 %v220_v7, %v179_v11  ;;  %647 = vperm.xlu2 %645, %v646_v40   ;;  %428 = vperm.xlu1 %657, %v425_v57  }
  0xb2   :  { %v631_v10 = vpop.permute.xlu1 %630 }
  0xb3   :  { %v633_v12 = vunpack.i.h.bf16 %v631_v10  ;;  %v632_v13 = vunpack.i.l.bf16 %v631_v10 }
  0xb5   :  { %v268_v20 = vmul.f32 %v632_v13, %v734_v41  ;;  %v269_v21 = vmul.f32 %v633_v12, %v734_v41 }
  0xb6   :  { %664 = vperm.xlu2 %645, %v663_v61  }
  0xb7   :  { %v276_v22 = vadd.f32 %v268_v20, %v227_v18  ;;  %v277_v23 = vadd.f32 %v269_v21, %v228_v19 }
  0xb9   :  { %v284_v29 = vmax.f32 %v276_v22, 0.0  ;;  %v285_v30 = vmax.f32 %v277_v23, 0.0 }
  0xba   :  { %v642_v31 = vpop.permute.xlu1 %641 }
  0xbb   :  { %v644_v36 = vunpack.i.h.bf16 %v642_v31  ;;  %v643_v37 = vunpack.i.l.bf16 %v642_v31  ;;  %v291_v38 = vpack.c.bf16 %v285_v30, %v284_v29 }
  0xbd   :  { %v266_v46 = vmul.f32 %v643_v37, %v734_v41  ;;  %v267_v47 = vmul.f32 %v644_v36, %v734_v41  ;;  %389 = vmatpush.bf16.msra.mxu0 %v291_v38  ;;  %515 = vmatpush.bf16.msra.mxu2 %v291_v38  ;;  %v488_v41 = vld [vmem:[#allocation2 + $0x20] sm:$0xff] }
  0xbe   :  { %516 = vmatpush.bf16.msra.mxu3 %v291_v38 }
  0xbf   :  { %v274_v49 = vadd.f32 %v266_v46, %v225_v42  ;;  %v275_v51 = vadd.f32 %v267_v47, %v226_v45 }
  0xc1   :  { %v282_v53 = vmax.f32 %v274_v49, 0.0  ;;  %v283_v54 = vmax.f32 %v275_v51, 0.0  ;;  %v458_v51 = vshrl.u32 %v457_v48, 7 }
  0xc3   :  { %v290_v58 = vpack.c.bf16 %v283_v54, %v282_v53  ;;  %vm459_vm1 = vcmp.lt.s32.totalorder %v458_v51, 4 }
  0xc5   :  { %390 = vmatpush.bf16.msra.mxu0 %v290_v58  ;;  %517 = vmatpush.bf16.msra.mxu2 %v290_v58 }
  0xc6   :  { %518 = vmatpush.bf16.msra.mxu3 %v290_v58 }
  0xc8   :  { %484 = vmatmul.msk.bf16.vlgmr.msra.gmra.mxu2 %vm370_vm0, %v489_v59  ;;  %483 = vmatmul.msk.bf16.vlgmr.msra.gmra.mxu0 %vm370_vm0, %v488_v41 }
  0xc9   :  { %485 = vmatmul.msk.bf16.vlgmr.msra.gmra.mxu3 %vm370_vm0, %v490_v60 }
  0xd9   :  { %486 = vmatmul.msk.bf16.gmra.mxu3 %vm370_vm0, %v491_v62 }
 0x104   :  { %v654_v4 = vpop.permute.xlu0 %653 }
 0x105   :  { %v656_v6 = vunpack.i.h.bf16 %v654_v4  ;;  %v655_v9 = vunpack.i.l.bf16 %v654_v4 }
 0x108   :  { %v648_v1 = vpop.permute.xlu2 %647 }
 0x109   :  { %v649_v3 = vunpack.i.l.bf16 %v648_v1  ;;  %v650_v7 = vunpack.i.h.bf16 %v648_v1 }
 0x110   :  { %v665_v14 = vpop.permute.xlu2 %664 }
 0x111   :  { %v667_v20 = vunpack.i.h.bf16 %v665_v14  ;;  %v666_v21 = vunpack.i.l.bf16 %v665_v14 }
 0x118   :  { %v660_v8 = vpop.permute.xlu1 %659 }
 0x119   :  { %v662_v12 = vunpack.i.h.bf16 %v660_v8  ;;  %v661_v13 = vunpack.i.l.bf16 %v660_v8 }
 0x120   :  { %v429_v38 = vpop.permute.xlu1 %428 }
 0x145   :  { %v392_v5 = vpop.f32.mrf.mxu0 }
 0x146   :  { %v393_v29 = vadd.f32 %v666_v21, %v392_v5 }
 0x148   :  { %v412_v34 = vmax.f32 %v393_v29, 0.0 }
 0x14b   :  { %v397_v50 = vpop.f32.mrf.mxu2 }
 0x14c   :  { %v402_v63 = vpop.f32.mrf.mxu3  ;;  %v398_v23 = vadd.f32 %v661_v13, %v397_v50 }
 0x14d   :  { %v403_v17 = vadd.f32 %v655_v9, %v402_v63  ;;  %v394_v26 = vpop.f32.mrf.mxu0 }
 0x14e   :  { %v395_v30 = vadd.f32 %v667_v20, %v394_v26  ;;  %v414_v33 = vmax.f32 %v398_v23, 0.0 }
 0x14f   :  { %v416_v27 = vmax.f32 %v403_v17, 0.0 }
 0x150   :  { %v413_v35 = vmax.f32 %v395_v30, 0.0 }
 0x152   :  { %v420_v37 = vpack.c.bf16 %v413_v35, %v412_v34 }
 0x153   :  { %v399_v16 = vpop.f32.mrf.mxu2 }
 0x154   :  { %v404_v0 = vpop.f32.mrf.mxu3  ;;  %v400_v24 = vadd.f32 %v662_v12, %v399_v16 }
 0x155   :  { %v405_v11 = vadd.f32 %v656_v6, %v404_v0 }
 0x156   :  { %v415_v32 = vmax.f32 %v400_v24, 0.0 }
 0x157   :  { %v417_v22 = vmax.f32 %v405_v11, 0.0 }
 0x158   :  { %v421_v36 = vpack.c.bf16 %v415_v32, %v414_v33 }
 0x159   :  { %v422_v31 = vpack.c.bf16 %v417_v22, %v416_v27 }
 0x15c   :  { %v407_v2 = vpop.f32.mrf.mxu3 }
 0x15d   :  { %v408_v10 = vadd.f32 %v649_v3, %v407_v2 }
 0x15f   :  { %v418_v18 = vmax.f32 %v408_v10, 0.0 }
 0x164   :  { %v409_v28 = vpop.f32.mrf.mxu3 }
 0x165   :  { %v410_v15 = vadd.f32 %v650_v7, %v409_v28 }
 0x167   :  { %v419_v19 = vmax.f32 %v410_v15, 0.0 }
 0x169   :  { %v423_v25 = vpack.c.bf16 %v419_v19, %v418_v18 }
 0x16b   :  { %438 = vmatpush.bf16.msra.mxu1 %v423_v25 }
 0x16f   :  { %439 = vmatpush.bf16.msra.mxu1 %v422_v31 }
 0x173   :  { %440 = vmatpush.bf16.msra.mxu1 %v421_v36 }
 0x177   :  { %441 = vmatpush.bf16.msra.mxu1 %v420_v37 }
 0x17a   :  { %487 = vmatmul.msk.bf16.vlgmr.msra.gmra.mxu1 %vm370_vm0, %v772_v52 }
 0x1f7   :  { %v443_v39 = vpop.f32.mrf.mxu1 }
 0x1f8   :  { %v444_v42 = vadd.f32 %v443_v39, %v429_v38 }
 0x1fa   :  { %v448_v43 = vand.u32 2147483647, %v444_v42  ;;  %v447_v53 = vmax.f32 %v444_v42, 0.0 }
 0x1fc   :  { %v449_v44 = vsub.f32 0.0, %v448_v43 }
 0x1fe   :  { %v450_v45 = vmul.f32 1.442695, %v449_v44 }
 0x1ff   :  { %v445_v46 = vpop.f32.mrf.mxu1 }
 0x200   :  { %668 = vpow2.f32 %v450_v45 }
 0x206   :  { %v669_v47 = vpop.eup %668 }
 0x207   :  { %v452_v40 = vadd.f32 1.0, %v669_v47 }
 0x209   :  { %670 = vlog2.f32 %v452_v40 }
 0x20f   :  { %v671_v49 = vpop.eup %670 }
 0x210   :  { %v454_v54 = vmul.f32 0.6931472, %v671_v49 }
 0x212   :  { %v455_v55 = vadd.f32 %v454_v54, %v447_v53 }
 0x214   :  { %v456_v56 = vadd.f32 1e-06, %v455_v55 }
 0x216   :  { %v460_v52 = vsel %vm459_vm1, %v444_v42, %v456_v56 }
 0x217   :  { %461 = vst [vmem:[%s786_s2] sm:$0xff] %v460_v52 }
 0x218   :  { %466 = vsyncpa [#allocation3], 1 }

</bundles_post_ra>
